<compile_context>
chip_gen: v7x
topology: tpu7x:2x2x1
jax: 0.10.0
libtpu: 0.0.40
codegen_flags: <defaults>
</compile_context>

<pallas_src>
import functools

import jax
import jax.numpy as jnp
from jax.experimental import pallas as pl
from jax.experimental.pallas import tpu as pltpu


# ---------------------------------------------------------------------------
# Kernel: one batch tile of the whole MLP chain (all weights VMEM-resident).
# ---------------------------------------------------------------------------
def mlp_kernel(alpha_ref, x_ref, w0_ref, b0_ref, wh_ref, bh_ref,
               wl_ref, bl_ref, o_ref):
    # First Linear: (TB, Din) @ (Din, N) + (1, N).  Input scaling is already
    # folded into w0 on the host.  K = Din is tiny (3); fine at this size.
    h = jnp.dot(x_ref[...], w0_ref[...],
                preferred_element_type=jnp.float32) + b0_ref[...]

    n_hidden = wh_ref.shape[0]                      # static
    for i in range(n_hidden):
        a = alpha_ref[i]                            # PReLU slope scalar (SMEM)
        # PReLU alpha is learnable and may leave (0, 1], so the
        # jnp.maximum(h, a*h) micro-opt is not applied (not always correct).
        h = jnp.where(h >= 0.0, h, a * h)
        h = jnp.dot(h, wh_ref[i],
                    preferred_element_type=jnp.float32) + bh_ref[i]

    # Final PReLU + Linear(N, Dout_padded); padded columns are zero weights.
    a = alpha_ref[n_hidden]
    h = jnp.where(h >= 0.0, h, a * h)
    o_ref[...] = (jnp.dot(h, wl_ref[...],
                          preferred_element_type=jnp.float32)
                  + bl_ref[...]).astype(o_ref.dtype)


# ---------------------------------------------------------------------------
# One-time factory: does all layout prep once, returns a jitted forward(x).
# Weights are given in the torch (out_features, in_features) convention.
# ---------------------------------------------------------------------------
def make_net_forward(scale, w0, b0, wh, bh, alpha, wl, bl,
                     *, block_batch=256, out_pad_mult=8):
    din = int(w0.shape[1])
    n = int(w0.shape[0])
    dout = int(wl.shape[0])
    num_hidden = int(wh.shape[0])

    # -------- one-time host-side parameter prep (pure layout plumbing) -----
    # Fold input scaling into the first weight: (x*s) @ W0^T == x @ (W0*s)^T.
    w0t = jnp.asarray((w0 * scale.reshape(1, din)).T, jnp.float32)      # (Din, N)
    wht = jnp.asarray(jnp.swapaxes(wh, 1, 2), jnp.float32)              # (H, N, N) in (in,out)
    b0r = jnp.asarray(b0.reshape(1, n), jnp.float32)
    bhr = jnp.asarray(bh.reshape(num_hidden, 1, n), jnp.float32)
    alpha_f = jnp.asarray(alpha, jnp.float32)                           # (H+1,)

    # Pad the final output dim.  out_pad_mult=8 minimizes HBM writeback for
    # tiny Dout (masked vst); set 128 for unmasked lane-dense stores instead.
    out_pad = ((dout + out_pad_mult - 1) // out_pad_mult) * out_pad_mult
    wlt = jnp.zeros((n, out_pad), jnp.float32).at[:, :dout].set(
        jnp.asarray(wl.T, jnp.float32))
    blp = jnp.zeros((1, out_pad), jnp.float32).at[:, :dout].set(
        jnp.asarray(bl.reshape(1, dout), jnp.float32))
    # Force materialization now so nothing above runs on the per-call path.
    w0t, wht, b0r, bhr, alpha_f, wlt, blp = jax.block_until_ready(
        (w0t, wht, b0r, bhr, alpha_f, wlt, blp))

    # TODO(synk): if the input pipeline can store x with Din padded to 8, the
    # HBM->VMEM DMA per tile moves contiguous lines instead of 12 B rows.

    @jax.jit
    def forward(x):
        batch = x.shape[0]
        # Sublane-aligned batch tile; <= block_batch to bound vreg pressure,
        # and small enough that realistic batches give grid >= 2 steps so the
        # two v7x TensorCores can both work ("parallel" batch axis).
        tb = min(block_batch, ((batch + 7) // 8) * 8)
        padded_batch = ((batch + tb - 1) // tb) * tb
        x_p = x if padded_batch == batch else jnp.pad(
            x, ((0, padded_batch - batch), (0, 0)))
        grid = (padded_batch // tb,)

        out = pl.pallas_call(
            mlp_kernel,
            out_shape=jax.ShapeDtypeStruct((padded_batch, out_pad), jnp.float32),
            grid=grid,
            in_specs=[
                # PReLU slopes: scalars in SMEM, untiled.
                pl.BlockSpec(memory_space=pltpu.MemorySpace.SMEM),
                # Activations: tiled over batch (pipelined/double-buffered).
                pl.BlockSpec((tb, din), lambda i: (i, 0)),
                # Weights / biases: constant block index -> VMEM-resident.
                pl.BlockSpec((din, n), lambda i: (0, 0)),
                pl.BlockSpec((1, n), lambda i: (0, 0)),
                pl.BlockSpec((num_hidden, n, n), lambda i: (0, 0, 0)),
                pl.BlockSpec((num_hidden, 1, n), lambda i: (0, 0, 0)),
                pl.BlockSpec((n, out_pad), lambda i: (0, 0)),
                pl.BlockSpec((1, out_pad), lambda i: (0, 0)),
            ],
            out_specs=pl.BlockSpec((tb, out_pad), lambda i: (i, 0)),
            compiler_params=pltpu.CompilerParams(
                dimension_semantics=("parallel",)),
        )(alpha_f, x_p, w0t, b0r, wht, bhr, wlt, blp)

        return out[:batch, :dout]

    return forward


# ---------------------------------------------------------------------------
# Helpers for the demo / reference.
# ---------------------------------------------------------------------------
def xavier_uniform(key, out_dim, in_dim):
    limit = (6.0 / (in_dim + out_dim)) ** 0.5
    return jax.random.uniform(key, (out_dim, in_dim), jnp.float32, -limit, limit)


def reference_forward(x, scale, w0, b0, wh, bh, alpha, wl, bl):
    """Pure-JAX reference mirroring the PyTorch forward (torch weight layout)."""
    h = x * scale
    h = h @ w0.T + b0
    for i in range(wh.shape[0]):
        h = jnp.where(h >= 0.0, h, alpha[i] * h)
        h = h @ wh[i].T + bh[i]
    h = jnp.where(h >= 0.0, h, alpha[wh.shape[0]] * h)
    return h @ wl.T + bl


if __name__ == "__main__":
    # Small hyper-parameters consistent with the PyTorch __init__:
    input_dim = 3          # input_scaling default has 3 entries
    output_dim = 2
    hidden_layers = 4      # number of (PReLU, Linear(N, N)) blocks
    neurons = 32
    batch = 8

    key = jax.random.PRNGKey(0)
    k_x, k_w0, k_wh, k_wl = jax.random.split(key, 4)

    # Deterministic synthetic parameters (Xavier-uniform weights, zero biases,
    # PReLU slope = 0.25 as in torch.nn.PReLU default).
    scale = jnp.array([1.0, 2.0, 0.5], dtype=jnp.float32)            # (Din,)
    w0 = xavier_uniform(k_w0, neurons, input_dim)                    # (N, Din)
    b0 = jnp.zeros((neurons,), jnp.float32)
    wh = jnp.stack([xavier_uniform(k, neurons, neurons)
                    for k in jax.random.split(k_wh, hidden_layers)]) # (H, N, N)
    bh = jnp.zeros((hidden_layers, neurons), jnp.float32)
    alpha = jnp.full((hidden_layers + 1,), 0.25, jnp.float32)        # PReLU slopes
    wl = xavier_uniform(k_wl, output_dim, neurons)                   # (Dout, N)
    bl = jnp.zeros((output_dim,), jnp.float32)

    x = jax.random.normal(k_x, (batch, input_dim), jnp.float32)

    # One-time prep (hoisted out of the per-call path), then forward.
    net_forward = make_net_forward(scale, w0, b0, wh, bh, alpha, wl, bl)
    out = jax.block_until_ready(net_forward(x))

    ref = reference_forward(x, scale, w0, b0, wh, bh, alpha, wl, bl)
    assert out.shape == (batch, output_dim)
    assert jnp.allclose(out, ref, atol=2e-5, rtol=1e-5), "mismatch vs JAX reference"

    print("KERNEL_OK")
</pallas_src>

<mosaic_0001>
module attributes {stable_mosaic.version = 11 : i64} {
  func.func @mlp_kernel(%arg0: i32, %arg1: memref<5xf32, #tpu.memory_space<smem>>, %arg2: memref<8x3xf32, #tpu.memory_space<vmem>>, %arg3: memref<3x32xf32, #tpu.memory_space<vmem>>, %arg4: memref<1x32xf32, #tpu.memory_space<vmem>>, %arg5: memref<4x32x32xf32, #tpu.memory_space<vmem>>, %arg6: memref<4x1x32xf32, #tpu.memory_space<vmem>>, %arg7: memref<32x8xf32, #tpu.memory_space<vmem>>, %arg8: memref<1x8xf32, #tpu.memory_space<vmem>>, %arg9: memref<8x8xf32, #tpu.memory_space<vmem>>) attributes {dimension_semantics = [#tpu.dimension_semantics<parallel>], iteration_bounds = array<i64: 1>, scalar_prefetch = 0 : i64, scratch_operands = 0 : i64, tpu.core_type = #tpu.core_type<tc>, window_params = [{transform_indices = @transform_0, window_bounds = array<i64: 5>}, {transform_indices = @transform_1, window_bounds = array<i64: 8, 3>}, {pipeline_mode = #tpu.pipeline_mode<synchronous>, transform_indices = @transform_2, window_bounds = array<i64: 3, 32>}, {pipeline_mode = #tpu.pipeline_mode<synchronous>, transform_indices = @transform_3, window_bounds = array<i64: 1, 32>}, {pipeline_mode = #tpu.pipeline_mode<synchronous>, transform_indices = @transform_4, window_bounds = array<i64: 4, 32, 32>}, {pipeline_mode = #tpu.pipeline_mode<synchronous>, transform_indices = @transform_5, window_bounds = array<i64: 4, 1, 32>}, {pipeline_mode = #tpu.pipeline_mode<synchronous>, transform_indices = @transform_6, window_bounds = array<i64: 32, 8>}, {pipeline_mode = #tpu.pipeline_mode<synchronous>, transform_indices = @transform_7, window_bounds = array<i64: 1, 8>}, {transform_indices = @transform_8, window_bounds = array<i64: 8, 8>}]} {
    %c0 = arith.constant 0 : index
    %c0_0 = arith.constant 0 : index
    %0 = vector.load %arg2[%c0, %c0_0] : memref<8x3xf32, #tpu.memory_space<vmem>>, vector<8x3xf32>
    %c0_1 = arith.constant 0 : index
    %c0_2 = arith.constant 0 : index
    %1 = vector.load %arg3[%c0_1, %c0_2] : memref<3x32xf32, #tpu.memory_space<vmem>>, vector<3x32xf32>
    %cst = arith.constant dense<0.000000e+00> : vector<8x32xf32>
    %2 = tpu.matmul %0, %1, %cst {dimension_numbers = #tpu.dot_dimension_numbers<[1], [0], [0], [1], [0, 0, 1, 1], [], []>} : vector<8x3xf32>, vector<3x32xf32>, vector<8x32xf32> -> vector<8x32xf32>
    %c0_3 = arith.constant 0 : index
    %c0_4 = arith.constant 0 : index
    %3 = vector.load %arg4[%c0_3, %c0_4] : memref<1x32xf32, #tpu.memory_space<vmem>>, vector<1x32xf32>
    %4 = vector.broadcast %3 : vector<1x32xf32> to vector<8x32xf32>
    %5 = arith.addf %2, %4 : vector<8x32xf32>
    %c0_5 = arith.constant 0 : index
    %6 = memref.load %arg1[%c0_5] : memref<5xf32, #tpu.memory_space<smem>>
    %cst_6 = arith.constant 0.000000e+00 : f32
    %7 = vector.broadcast %cst_6 : f32 to vector<8x32xf32>
    %8 = arith.cmpf oge, %5, %7 : vector<8x32xf32>
    %9 = vector.broadcast %6 : f32 to vector<8x32xf32>
    %10 = arith.mulf %9, %5 : vector<8x32xf32>
    %11 = arith.select %8, %5, %10 : vector<8x32xi1>, vector<8x32xf32>
    %c0_7 = arith.constant 0 : index
    %c0_8 = arith.constant 0 : index
    %c0_9 = arith.constant 0 : index
    %12 = vector.load %arg5[%c0_7, %c0_8, %c0_9] : memref<4x32x32xf32, #tpu.memory_space<vmem>>, vector<1x32x32xf32>
    %13 = vector.shape_cast %12 : vector<1x32x32xf32> to vector<32x32xf32>
    %cst_10 = arith.constant dense<0.000000e+00> : vector<8x32xf32>
    %14 = tpu.matmul %11, %13, %cst_10 {dimension_numbers = #tpu.dot_dimension_numbers<[1], [0], [0], [1], [0, 0, 1, 1], [], []>} : vector<8x32xf32>, vector<32x32xf32>, vector<8x32xf32> -> vector<8x32xf32>
    %c0_11 = arith.constant 0 : index
    %c0_12 = arith.constant 0 : index
    %c0_13 = arith.constant 0 : index
    %15 = vector.load %arg6[%c0_11, %c0_12, %c0_13] : memref<4x1x32xf32, #tpu.memory_space<vmem>>, vector<1x1x32xf32>
    %16 = vector.shape_cast %15 : vector<1x1x32xf32> to vector<1x32xf32>
    %17 = vector.broadcast %16 : vector<1x32xf32> to vector<8x32xf32>
    %18 = arith.addf %14, %17 : vector<8x32xf32>
    %c1 = arith.constant 1 : index
    %19 = memref.load %arg1[%c1] : memref<5xf32, #tpu.memory_space<smem>>
    %cst_14 = arith.constant 0.000000e+00 : f32
    %20 = vector.broadcast %cst_14 : f32 to vector<8x32xf32>
    %21 = arith.cmpf oge, %18, %20 : vector<8x32xf32>
    %22 = vector.broadcast %19 : f32 to vector<8x32xf32>
    %23 = arith.mulf %22, %18 : vector<8x32xf32>
    %24 = arith.select %21, %18, %23 : vector<8x32xi1>, vector<8x32xf32>
    %c1_15 = arith.constant 1 : index
    %c0_16 = arith.constant 0 : index
    %c0_17 = arith.constant 0 : index
    %25 = vector.load %arg5[%c1_15, %c0_16, %c0_17] : memref<4x32x32xf32, #tpu.memory_space<vmem>>, vector<1x32x32xf32>
    %26 = vector.shape_cast %25 : vector<1x32x32xf32> to vector<32x32xf32>
    %cst_18 = arith.constant dense<0.000000e+00> : vector<8x32xf32>
    %27 = tpu.matmul %24, %26, %cst_18 {dimension_numbers = #tpu.dot_dimension_numbers<[1], [0], [0], [1], [0, 0, 1, 1], [], []>} : vector<8x32xf32>, vector<32x32xf32>, vector<8x32xf32> -> vector<8x32xf32>
    %c1_19 = arith.constant 1 : index
    %c0_20 = arith.constant 0 : index
    %c0_21 = arith.constant 0 : index
    %28 = vector.load %arg6[%c1_19, %c0_20, %c0_21] : memref<4x1x32xf32, #tpu.memory_space<vmem>>, vector<1x1x32xf32>
    %29 = vector.shape_cast %28 : vector<1x1x32xf32> to vector<1x32xf32>
    %30 = vector.broadcast %29 : vector<1x32xf32> to vector<8x32xf32>
    %31 = arith.addf %27, %30 : vector<8x32xf32>
    %c2 = arith.constant 2 : index
    %32 = memref.load %arg1[%c2] : memref<5xf32, #tpu.memory_space<smem>>
    %cst_22 = arith.constant 0.000000e+00 : f32
    %33 = vector.broadcast %cst_22 : f32 to vector<8x32xf32>
    %34 = arith.cmpf oge, %31, %33 : vector<8x32xf32>
    %35 = vector.broadcast %32 : f32 to vector<8x32xf32>
    %36 = arith.mulf %35, %31 : vector<8x32xf32>
    %37 = arith.select %34, %31, %36 : vector<8x32xi1>, vector<8x32xf32>
    %c2_23 = arith.constant 2 : index
    %c0_24 = arith.constant 0 : index
    %c0_25 = arith.constant 0 : index
    %38 = vector.load %arg5[%c2_23, %c0_24, %c0_25] : memref<4x32x32xf32, #tpu.memory_space<vmem>>, vector<1x32x32xf32>
    %39 = vector.shape_cast %38 : vector<1x32x32xf32> to vector<32x32xf32>
    %cst_26 = arith.constant dense<0.000000e+00> : vector<8x32xf32>
    %40 = tpu.matmul %37, %39, %cst_26 {dimension_numbers = #tpu.dot_dimension_numbers<[1], [0], [0], [1], [0, 0, 1, 1], [], []>} : vector<8x32xf32>, vector<32x32xf32>, vector<8x32xf32> -> vector<8x32xf32>
    %c2_27 = arith.constant 2 : index
    %c0_28 = arith.constant 0 : index
    %c0_29 = arith.constant 0 : index
    %41 = vector.load %arg6[%c2_27, %c0_28, %c0_29] : memref<4x1x32xf32, #tpu.memory_space<vmem>>, vector<1x1x32xf32>
    %42 = vector.shape_cast %41 : vector<1x1x32xf32> to vector<1x32xf32>
    %43 = vector.broadcast %42 : vector<1x32xf32> to vector<8x32xf32>
    %44 = arith.addf %40, %43 : vector<8x32xf32>
    %c3 = arith.constant 3 : index
    %45 = memref.load %arg1[%c3] : memref<5xf32, #tpu.memory_space<smem>>
    %cst_30 = arith.constant 0.000000e+00 : f32
    %46 = vector.broadcast %cst_30 : f32 to vector<8x32xf32>
    %47 = arith.cmpf oge, %44, %46 : vector<8x32xf32>
    %48 = vector.broadcast %45 : f32 to vector<8x32xf32>
    %49 = arith.mulf %48, %44 : vector<8x32xf32>
    %50 = arith.select %47, %44, %49 : vector<8x32xi1>, vector<8x32xf32>
    %c3_31 = arith.constant 3 : index
    %c0_32 = arith.constant 0 : index
    %c0_33 = arith.constant 0 : index
    %51 = vector.load %arg5[%c3_31, %c0_32, %c0_33] : memref<4x32x32xf32, #tpu.memory_space<vmem>>, vector<1x32x32xf32>
    %52 = vector.shape_cast %51 : vector<1x32x32xf32> to vector<32x32xf32>
    %cst_34 = arith.constant dense<0.000000e+00> : vector<8x32xf32>
    %53 = tpu.matmul %50, %52, %cst_34 {dimension_numbers = #tpu.dot_dimension_numbers<[1], [0], [0], [1], [0, 0, 1, 1], [], []>} : vector<8x32xf32>, vector<32x32xf32>, vector<8x32xf32> -> vector<8x32xf32>
    %c3_35 = arith.constant 3 : index
    %c0_36 = arith.constant 0 : index
    %c0_37 = arith.constant 0 : index
    %54 = vector.load %arg6[%c3_35, %c0_36, %c0_37] : memref<4x1x32xf32, #tpu.memory_space<vmem>>, vector<1x1x32xf32>
    %55 = vector.shape_cast %54 : vector<1x1x32xf32> to vector<1x32xf32>
    %56 = vector.broadcast %55 : vector<1x32xf32> to vector<8x32xf32>
    %57 = arith.addf %53, %56 : vector<8x32xf32>
    %c4 = arith.constant 4 : index
    %58 = memref.load %arg1[%c4] : memref<5xf32, #tpu.memory_space<smem>>
    %cst_38 = arith.constant 0.000000e+00 : f32
    %59 = vector.broadcast %cst_38 : f32 to vector<8x32xf32>
    %60 = arith.cmpf oge, %57, %59 : vector<8x32xf32>
    %61 = vector.broadcast %58 : f32 to vector<8x32xf32>
    %62 = arith.mulf %61, %57 : vector<8x32xf32>
    %63 = arith.select %60, %57, %62 : vector<8x32xi1>, vector<8x32xf32>
    %c0_39 = arith.constant 0 : index
    %c0_40 = arith.constant 0 : index
    %64 = vector.load %arg7[%c0_39, %c0_40] : memref<32x8xf32, #tpu.memory_space<vmem>>, vector<32x8xf32>
    %cst_41 = arith.constant dense<0.000000e+00> : vector<8x8xf32>
    %65 = tpu.matmul %63, %64, %cst_41 {dimension_numbers = #tpu.dot_dimension_numbers<[1], [0], [0], [1], [0, 0, 1, 1], [], []>} : vector<8x32xf32>, vector<32x8xf32>, vector<8x8xf32> -> vector<8x8xf32>
    %c0_42 = arith.constant 0 : index
    %c0_43 = arith.constant 0 : index
    %66 = vector.load %arg8[%c0_42, %c0_43] : memref<1x8xf32, #tpu.memory_space<vmem>>, vector<1x8xf32>
    %67 = vector.broadcast %66 : vector<1x8xf32> to vector<8x8xf32>
    %68 = arith.addf %65, %67 : vector<8x8xf32>
    %c0_44 = arith.constant 0 : index
    %c0_45 = arith.constant 0 : index
    %69 = vector.load %arg9[%c0_44, %c0_45] : memref<8x8xf32, #tpu.memory_space<vmem>>, vector<8x8xf32>
    tpu.vector_store %arg9[%c0_44, %c0_45], %68 {strides = array<i32>} : memref<8x8xf32, #tpu.memory_space<vmem>>, vector<8x8xf32>,
    return
  }
  func.func @transform_0(%arg0: i32) -> i32 {
    %c0_i32 = arith.constant 0 : i32
    %c0_i32_0 = arith.constant 0 : i32
    return %c0_i32 : i32
  }
  func.func @transform_1(%arg0: i32) -> (i32, i32) {
    %c0_i32 = arith.constant 0 : i32
    %c0_i32_0 = arith.constant 0 : i32
    return %arg0, %c0_i32 : i32, i32
  }
  func.func @transform_2(%arg0: i32) -> (i32, i32) {
    %c0_i32 = arith.constant 0 : i32
    %c0_i32_0 = arith.constant 0 : i32
    %c0_i32_1 = arith.constant 0 : i32
    return %c0_i32, %c0_i32_0 : i32, i32
  }
  func.func @transform_3(%arg0: i32) -> (i32, i32) {
    %c0_i32 = arith.constant 0 : i32
    %c0_i32_0 = arith.constant 0 : i32
    %c0_i32_1 = arith.constant 0 : i32
    return %c0_i32, %c0_i32_0 : i32, i32
  }
  func.func @transform_4(%arg0: i32) -> (i32, i32, i32) {
    %c0_i32 = arith.constant 0 : i32
    %c0_i32_0 = arith.constant 0 : i32
    %c0_i32_1 = arith.constant 0 : i32
    %c0_i32_2 = arith.constant 0 : i32
    return %c0_i32, %c0_i32_0, %c0_i32_1 : i32, i32, i32
  }
  func.func @transform_5(%arg0: i32) -> (i32, i32, i32) {
    %c0_i32 = arith.constant 0 : i32
    %c0_i32_0 = arith.constant 0 : i32
    %c0_i32_1 = arith.constant 0 : i32
    %c0_i32_2 = arith.constant 0 : i32
    return %c0_i32, %c0_i32_0, %c0_i32_1 : i32, i32, i32
  }
  func.func @transform_6(%arg0: i32) -> (i32, i32) {
    %c0_i32 = arith.constant 0 : i32
    %c0_i32_0 = arith.constant 0 : i32
    %c0_i32_1 = arith.constant 0 : i32
    return %c0_i32, %c0_i32_0 : i32, i32
  }
  func.func @transform_7(%arg0: i32) -> (i32, i32) {
    %c0_i32 = arith.constant 0 : i32
    %c0_i32_0 = arith.constant 0 : i32
    %c0_i32_1 = arith.constant 0 : i32
    return %c0_i32, %c0_i32_0 : i32, i32
  }
  func.func @transform_8(%arg0: i32) -> (i32, i32) {
    %c0_i32 = arith.constant 0 : i32
    %c0_i32_0 = arith.constant 0 : i32
    return %arg0, %c0_i32 : i32, i32
  }
}

</mosaic_0001>

<bundles_post_ra>
// kernel: forward.1
= control target key start
LH: loop header
LB: loop body
LE: loop exit
PB: predicated region body
PF: predicated region fallthrough
CT: control target
= control target key end

     0   :  { %13 = vsyncpa [#allocation4], 0  ;;  %s919_s0 = inlined_call_operand.vmem [shape: f32[5], index: 0, kind: input, shape index: {}]   ;;  %s920_s1 = inlined_call_operand.vmem [shape: f32[8,3], index: 1, kind: input, shape index: {}]   ;;  %s921_s2 = inlined_call_operand.vmem [shape: f32[3,32], index: 2, kind: input, shape index: {}]   ;;  %s922_s3 = inlined_call_operand.vmem [shape: f32[1,32], index: 3, kind: input, shape index: {}]   ;;  %s923_s4 = inlined_call_operand.hbm [shape: f32[4,32,32], index: 4, kind: input, shape index: {}]   ;;  %s924_s5 = inlined_call_operand.vmem [shape: f32[4,1,32], index: 5, kind: input, shape index: {}]   ;;  %s925_s6 = inlined_call_operand.vmem [shape: f32[32,8], index: 6, kind: input, shape index: {}]   ;;  %s926_s7 = inlined_call_operand.vmem [shape: f32[1,8], index: 7, kind: input, shape index: {}]   ;;  %s927_s8 = inlined_call_operand.vmem [shape: f32[8,8], index: 8, kind: output, shape index: {}]  }
   0x1   :  { %s21_s29 = sshll.u32 %s919_s0, 4  ;;  %s22_s29 = int_to_ptr.vmem [resolvable:$true] %s21_s29 }
   0x2   :  { %14 = vsyncpa [#allocation3], 0  ;;  %s747_s30 = scalar_lea.vmem %s22_s29, 16  ;;  %p752_p1 = scmp.lt.s32.totalorder %s22_s29, %s22_s29 }
   0x3   :  { %p748_p0 = scmp.ne.s32.totalorder %s22_s29, %s747_s30  ;;  %p753_p2 = scmp.lt.s32.totalorder %s747_s30, %s747_s30 }
   0x5   :  { %p754_p3 = por %p753_p2, %p752_p1 }
   0x7   :  { %p755_p4 = pnand %p754_p3, %p748_p0 }
   0x9   :  { %758 = shalt.err (!%p755_p4)
}
   0xa   :  { %s785_s9 = smov [#allocation2]   ;;  %s786_s10 = smov [#allocation5]  }
   0xb   :  { %24 = dma.vmem_to_smem %s22_s29, 16, %s785_s9, [#allocation4]  }
   0xc   :  { %s36_s11 = sshll.u32 %s786_s10, 4  ;;  %s759_s14 = scalar_lea.hbm %s923_s4, 2048  ;;  %s37_s11 = int_to_ptr.vmem [resolvable:$true] %s36_s11 }
   0xd   :  { %p760_p5 = scmp.ne.s32.totalorder %s923_s4, %s759_s14  ;;  %p763_p6 = scmp.lt.u32.totalorder %s759_s14, %s923_s4 }
   0xf   :  { %p765_p7 = pnand %p763_p6, %p760_p5 }
  0x11   :  { %768 = shalt.err (!%p765_p7)
}
  0x12   :  { %s769_s18 = scalar_lea.vmem %s37_s11, 2048  ;;  %p774_p9 = scmp.lt.s32.totalorder %s37_s11, %s37_s11 }
  0x13   :  { %p770_p8 = scmp.ne.s32.totalorder %s37_s11, %s769_s18  ;;  %p775_p10 = scmp.lt.s32.totalorder %s769_s18, %s769_s18 }
  0x15   :  { %p776_p11 = por %p775_p10, %p774_p9 }
  0x17   :  { %p777_p12 = pnand %p776_p11, %p770_p8 }
  0x19   :  { %780 = shalt.err (!%p777_p12)
}
  0x1a   :  { %s787_s19 = smov 128   ;;  %s788_s20 = smov 8  }
  0x1b   :  { %42 = dma.hbm_to_vmem [thread:$0]  %s923_s4, 2048, %s37_s11, [#allocation3], %s787_s19, %s787_s19, %s788_s20  }
  0x1c   :  { %781 = dma.done.wait [#allocation4], 16  }
  0x1d   :  { %782 = vsyncadd [#allocation4], 4294967280 }
  0x1e   :  { %783 = dma.done.wait [#allocation3], 2048  }
  0x1f   :  { %784 = vsyncadd [#allocation3], 4294965248 }
  0x20   :  { %55 = sfence }
  0x21   :  { %v57_v0 = vld [vmem:[%s921_s2] sm:$0x7]  ;;  %vm69_vm0 = vcmask 1042432   ;;  %v789_v2 = vmov 0.0   ;;  %vm790_vm1 = vmmov 0   ;;  %vm65_vm2 = vcmask 23552  }
  0x22   :  { %v56_v1 = vld [vmem:[%s920_s1] sm:$0xff]  ;;  %650 = vmatprep.subr.mxu0 %v789_v2  ;;  %652 = vmatprep.mubr.msk.f32.mxu0 %vm790_vm1, %v789_v2  ;;  %v149_v4 = vld [vmem:[#allocation5 + $0x8] sm:$0xff]  ;;  %v791_v5 = vmov 0.0|0.0   ;;  %v150_v7 = vld [vmem:[#allocation5 + $0x10] sm:$0xff]  ;;  %s143_s1 = sld [smem:[#allocation2]]  ;;  %vm159_vm4 = vcmask 261120  }
  0x23   :  { %v148_v3 = vld [vmem:[#allocation5] sm:$0xff]  ;;  %651 = vmatpush3.msk.msra.mxu0 %vm69_vm0, %v57_v0  ;;  %710 = vmatprep.subr.bf16.mxu1 %v791_v5  ;;  %v151_v8 = vld [vmem:[#allocation5 + $0x18] sm:$0xff]  ;;  %v240_v11 = vld [vmem:[#allocation5 + $0x28] sm:$0xff]  ;;  %s612_s29 = sld [smem:[#allocation2 + $0x2]]  ;;  %s616_s14 = sld [smem:[#allocation2 + $0x3]]  ;;  %vm595_vm9 = vcmask 64512  }
  0x24   :  { %v711_v6 = vpack.c.bf16 %v149_v4, %v148_v3  ;;  %653 = vmatmul.mubr.msk.f32.vlgmr.msra.gmra.mrb[0].mxu0 %vm65_vm2, %v56_v1  ;;  %663 = vmatprep.mubr.msk.f32.mxu1 %vm790_vm1, %v789_v2  ;;  %v714_v9 = vpack.c.bf16 %v151_v8, %v150_v7  ;;  %v239_v10 = vld [vmem:[#allocation5 + $0x20] sm:$0xff]  ;;  %v241_v20 = vld [vmem:[#allocation5 + $0x30] sm:$0xff]  ;;  %v242_v21 = vld [vmem:[#allocation5 + $0x38] sm:$0xff]  ;;  %s620_s20 = sld [smem:[#allocation2 + $0x4]] }
  0x25   :  { %716 = vmatprep.subr.bf16.mxu0 %v791_v5  ;;  %674 = vmatprep.mubr.msk.f32.mxu0 %vm790_vm1, %v789_v2  ;;  %v717_v12 = vpack.c.bf16 %v240_v11, %v239_v10  ;;  %v603_v13 = vld [vmem:[%s922_s3] ss:$0 sm:$0xff]  ;;  %v720_v22 = vpack.c.bf16 %v242_v21, %v241_v20  ;;  %v331_v24 = vld [vmem:[#allocation5 + $0x48] sm:$0xff]  ;;  %s608_s3 = sld [smem:[#allocation2 + $0x1]]  ;;  %v332_v33 = vld [vmem:[#allocation5 + $0x50] sm:$0xff] }
  0x26   :  { %712 = vmatpush3.bf16.msra.mxu1 %v711_v6  ;;  %v330_v23 = vld [vmem:[#allocation5 + $0x40] sm:$0xff]  ;;  %v333_v34 = vld [vmem:[#allocation5 + $0x58] sm:$0xff]  ;;  %v422_v37 = vld [vmem:[#allocation5 + $0x68] sm:$0xff] }
  0x27   :  { %713 = vmatprep.subr.bf16.mxu1 %v791_v5  ;;  %718 = vmatpush3.bf16.msra.mxu0 %v717_v12  ;;  %v723_v25 = vpack.c.bf16 %v331_v24, %v330_v23  ;;  %v606_v26 = vld [vmem:[%s924_s5] ss:$0 sm:$0xff]  ;;  %v726_v35 = vpack.c.bf16 %v333_v34, %v332_v33  ;;  %v610_v39 = vld [vmem:[%s924_s5 + $0x1] ss:$0 sm:$0xff]  ;;  %v423_v46 = vld [vmem:[#allocation5 + $0x70] sm:$0xff] }
  0x28   :  { %719 = vmatprep.subr.bf16.mxu0 %v791_v5  ;;  %v145_v15 = vstv %s143_s1  ;;  %v421_v36 = vld [vmem:[#allocation5 + $0x60] sm:$0xff]  ;;  %v424_v47 = vld [vmem:[#allocation5 + $0x78] sm:$0xff]  ;;  %v512_v50 = vld [vmem:[%s925_s6 + $0x8] sm:$0xff] }
  0x29   :  { %v729_v38 = vpack.c.bf16 %v422_v37, %v421_v36  ;;  %v326_v41 = vstv %s612_s29  ;;  %v732_v48 = vpack.c.bf16 %v424_v47, %v423_v46  ;;  %v511_v49 = vld [vmem:[%s925_s6] sm:$0xff]  ;;  %v417_v54 = vstv %s616_s14  ;;  %v513_v59 = vld [vmem:[%s925_s6 + $0x10] sm:$0xff] }
  0x2a   :  { %715 = vmatpush3.bf16.msra.mxu1 %v714_v9  ;;  %v735_v51 = vpack.c.bf16 %v512_v50, %v511_v49  ;;  %v614_v52 = vld [vmem:[%s924_s5 + $0x2] ss:$0 sm:$0xff]  ;;  %v514_v60 = vld [vmem:[%s925_s6 + $0x18] sm:$0xff]  ;;  %v618_v62 = vld [vmem:[%s924_s5 + $0x3] ss:$0 sm:$0xff]  ;;  %v508_v0 = vstv %s620_s20 }
  0x2b   :  { %722 = vmatprep.subr.bf16.mxu1 %v791_v5  ;;  %721 = vmatpush3.bf16.msra.mxu0 %v720_v22  ;;  %v235_v28 = vstv %s608_s3  ;;  %v738_v61 = vpack.c.bf16 %v514_v60, %v513_v59 }
  0x2c   :  { %728 = vmatprep.subr.bf16.mxu0 %v791_v5 }
  0xf7   :  { %v139_v14 = vpop.f32.mrb[0].mxu0 }
  0xf8   :  { %v140_v16 = vadd.f32 %v603_v13, %v139_v14  ;;  %v654_v17 = vpop.f32.mrb[1].mxu0 }
  0xfa   :  { %vm144_vm3 = vcmp.ge.f32.partialorder %v140_v16, 0.0  ;;  %v146_v18 = vmul.f32 %v145_v15, %v140_v16 }
  0xfc   :  { %v147_v19 = vsel %vm144_vm3, %v140_v16, %v146_v18 }
  0xfd   :  { %664 = vmatmul.mubr.msk.f32.vlgmr.msra.gmra.mrb[0].mxu1 %vm159_vm4, %v147_v19 }
  0xfe   :  { %685 = vmatprep.mubr.msk.f32.mxu1 %vm790_vm1, %v789_v2  ;;  %724 = vmatpush3.bf16.msra.mxu1 %v723_v25 }
  0xff   :  { %725 = vmatprep.subr.bf16.mxu1 %v791_v5 }
 0x102   :  { %727 = vmatpush3.bf16.msra.mxu1 %v726_v35 }
 0x103   :  { %734 = vmatprep.subr.bf16.mxu1 %v791_v5 }
 0x1d0   :  { %v229_v27 = vpop.f32.mrb[0].mxu1 }
 0x1d1   :  { %v230_v29 = vadd.f32 %v606_v26, %v229_v27  ;;  %v665_v30 = vpop.f32.mrb[1].mxu1 }
 0x1d3   :  { %vm234_vm5 = vcmp.ge.f32.partialorder %v230_v29, 0.0  ;;  %v236_v31 = vmul.f32 %v235_v28, %v230_v29 }
 0x1d5   :  { %v237_v32 = vsel %vm234_vm5, %v230_v29, %v236_v31 }
 0x1d6   :  { %675 = vmatmul.mubr.msk.f32.vlgmr.msra.gmra.mrb[2].mxu0 %vm159_vm4, %v237_v32 }
 0x1d7   :  { %696 = vmatprep.mubr.msk.f32.mxu0 %vm790_vm1, %v789_v2  ;;  %730 = vmatpush3.bf16.msra.mxu0 %v729_v38 }
 0x1d8   :  { %731 = vmatprep.subr.bf16.mxu0 %v791_v5 }
 0x1db   :  { %733 = vmatpush3.bf16.msra.mxu0 %v732_v48 }
 0x2a9   :  { %v320_v40 = vpop.f32.mrb[2].mxu0 }
 0x2aa   :  { %v321_v42 = vadd.f32 %v610_v39, %v320_v40  ;;  %v676_v43 = vpop.f32.mrb[3].mxu0 }
 0x2ac   :  { %vm325_vm6 = vcmp.ge.f32.partialorder %v321_v42, 0.0  ;;  %v327_v44 = vmul.f32 %v326_v41, %v321_v42 }
 0x2ae   :  { %v328_v45 = vsel %vm325_vm6, %v321_v42, %v327_v44 }
 0x2af   :  { %686 = vmatmul.mubr.msk.f32.vlgmr.msra.gmra.mrb[2].mxu1 %vm159_vm4, %v328_v45 }
 0x2b0   :  { %707 = vmatprep.mubr.msk.f32.mxu1 %vm790_vm1, %v789_v2  ;;  %736 = vmatpush3.bf16.msra.mxu1 %v735_v51 }
 0x2b1   :  { %737 = vmatprep.subr.bf16.mxu1 %v791_v5  ;;  %v621_v5 = vld [vmem:[%s926_s7] ss:$0 sm:$0xff] }
 0x2b4   :  { %739 = vmatpush3.bf16.msra.mxu1 %v738_v61 }
 0x382   :  { %v411_v53 = vpop.f32.mrb[2].mxu1 }
 0x383   :  { %v412_v55 = vadd.f32 %v614_v52, %v411_v53  ;;  %v687_v56 = vpop.f32.mrb[3].mxu1 }
 0x385   :  { %vm416_vm7 = vcmp.ge.f32.partialorder %v412_v55, 0.0  ;;  %v418_v57 = vmul.f32 %v417_v54, %v412_v55 }
 0x387   :  { %v419_v58 = vsel %vm416_vm7, %v412_v55, %v418_v57 }
 0x388   :  { %697 = vmatmul.mubr.msk.f32.vlgmr.msra.gmra.mrb[4].mxu0 %vm159_vm4, %v419_v58 }
 0x45b   :  { %v502_v63 = vpop.f32.mrb[4].mxu0 }
 0x45c   :  { %v503_v1 = vadd.f32 %v618_v62, %v502_v63  ;;  %v698_v2 = vpop.f32.mrb[5].mxu0 }
 0x45e   :  { %vm507_vm8 = vcmp.ge.f32.partialorder %v503_v1, 0.0  ;;  %v509_v3 = vmul.f32 %v508_v0, %v503_v1 }
 0x460   :  { %v510_v4 = vsel %vm507_vm8, %v503_v1, %v509_v3 }
 0x461   :  { %708 = vmatmul.mubr.msk.f32.vlgmr.msra.gmra.mrb[4].mxu1 %vm159_vm4, %v510_v4 }
 0x534   :  { %v591_v6 = vpop.f32.mrb[4].mxu1 }
 0x535   :  { %v592_v7 = vadd.f32 %v621_v5, %v591_v6  ;;  %v709_v8 = vpop.f32.mrb[5].mxu1 }
 0x537   :  { %596 = vst.msk [vmem:[%s927_s8] sm:$0xff] %vm595_vm9, %v592_v7 }
 0x538   :  { %601 = vsyncpa [#allocation3], 1 }
 0x539   :  { %602 = vsyncpa [#allocation4], 1 }

</bundles_post_ra>
